<compile_context>
chip_gen: v5e
topology: v5e:2x2
jax: 0.10.0
libtpu: 0.0.40
codegen_flags: <defaults>
</compile_context>

<pallas_src>
import functools

import jax
import jax.numpy as jnp
from jax.experimental import pallas as pl
from jax.experimental.pallas import tpu as pltpu

LN_EPS = 1e-5  # nn.LayerNorm default


def _round_up(x, m):
    return ((x + m - 1) // m) * m


def _default_vmem_budget():
    """Generation-aware VMEM byte budget used for tile sizing."""
    try:
        cap = int(pltpu.get_tpu_info().vmem_capacity_bytes)
    except Exception:
        cap = 64 * 1024 * 1024  # conservative: v7x per-TensorCore VMEM
    # ~25% headroom for compiler-internal scratch; never ask for >100 MiB.
    return min(int(cap * 3 // 4), 100 * 1024 * 1024)


def prepare_classifier_params(gamma, beta, weight, bias, *, vmem_budget=None):
    """Pad & transpose the parameters ONCE (outside the per-call forward).

    weight is in PyTorch nn.Linear layout: (nb_classes, embed_dim).
    Returns padded device arrays plus static tiling metadata.
    """
    C, D = weight.shape
    assert gamma.shape == (D,) and beta.shape == (D,) and bias.shape == (C,)

    budget = int(vmem_budget) if vmem_budget is not None else _default_vmem_budget()
    Dp = _round_up(D, 128)       # lane-aligned contraction dim
    Cp0 = _round_up(C, 128)      # lane-dense output dim
    w_item = jnp.dtype(weight.dtype).itemsize

    # Class tile: keep the whole (double-buffered) weight resident when it
    # fits (-> DMA'd from HBM exactly once); else largest 128-multiple <=1024
    # whose double-buffered tile fits the remaining budget.
    reserve = 20 * 1024 * 1024                      # room for x / out buffers
    w_budget = max(budget - reserve, budget // 3)
    if 2 * Dp * Cp0 * w_item <= w_budget:
        block_c = Cp0
    else:
        block_c = (w_budget // (2 * Dp * w_item)) // 128 * 128
        block_c = int(max(128, min(1024, block_c)))
    Cp = _round_up(Cp0, block_c)

    w_t = jnp.transpose(weight)                     # (D, C): plain [B,D]@[D,C]
    if (Dp, Cp) == (D, C):
        w_p = w_t
    else:
        w_p = jnp.zeros((Dp, Cp), dtype=weight.dtype).at[:D, :C].set(w_t)
    gamma_p = jnp.zeros((1, Dp), dtype=gamma.dtype).at[0, :D].set(gamma)
    beta_p = jnp.zeros((1, Dp), dtype=beta.dtype).at[0, :D].set(beta)
    bias_p = jnp.zeros((1, Cp), dtype=bias.dtype).at[0, :C].set(bias)

    return {
        "gamma": gamma_p, "beta": beta_p, "w": w_p, "bias": bias_p,
        "d": D, "c": C, "dp": Dp, "cp": Cp, "block_c": int(block_c),
        "vmem_budget": budget,
    }


def _classifier_kernel(x_ref, gamma_ref, beta_ref, w_ref, b_ref, o_ref,
                       *, d_true, needs_mask):
    # --- LayerNorm over the (true) embed dim: two-pass mean / centered var ---
    x = x_ref[...].astype(jnp.float32)                        # (bm, Dp)
    inv_d = jnp.float32(1.0 / d_true)
    mean = jnp.sum(x, axis=-1, keepdims=True) * inv_d         # padded lanes are 0
    centered = x - mean
    if needs_mask:
        lane = jax.lax.broadcasted_iota(jnp.int32, centered.shape, 1)
        centered = jnp.where(lane < d_true, centered, 0.0)
    var = jnp.sum(centered * centered, axis=-1, keepdims=True) * inv_d
    xn = centered * jax.lax.rsqrt(var + LN_EPS)
    # Padded feature lanes carry gamma=0 / beta=0 / zero weight rows.
    xn = xn * gamma_ref[...].astype(jnp.float32) + beta_ref[...].astype(jnp.float32)

    # --- Linear head: [bm, Dp] @ [Dp, bc] + bias, MXU-native operand dtype ---
    xn = xn.astype(w_ref.dtype)                               # bf16 stays bf16
    logits = jnp.dot(xn, w_ref[...], preferred_element_type=jnp.float32)
    o_ref[...] = (logits + b_ref[...].astype(jnp.float32)).astype(o_ref.dtype)


def continual_classifier_forward(x, params, *, block_m=None):
    """x: (B, embed_dim); params: output of prepare_classifier_params."""
    B, D = x.shape
    assert D == params["d"], "embed_dim mismatch"
    Dp, Cp, block_c, C = params["dp"], params["cp"], params["block_c"], params["c"]
    nc = Cp // block_c

    x_item = jnp.dtype(x.dtype).itemsize
    w_item = jnp.dtype(params["w"].dtype).itemsize
    budget = params["vmem_budget"]
    row_mult = 16 if params["w"].dtype == jnp.bfloat16 else 8

    def _need(bm):  # double-buffered tiles + small param blocks
        return (2 * bm * Dp * x_item + 2 * Dp * block_c * w_item
                + 2 * bm * block_c * x_item + 2 * (2 * Dp + block_c) * 4)

    if block_m is None:
        block_m = min(_round_up(B, row_mult), 512)
        # Shrink block_m (not block_c) until the working set fits the budget.
        while block_m > row_mult and _need(block_m) > budget:
            block_m = max(row_mult, (block_m // 2) // row_mult * row_mult)
    block_m = max(row_mult, (int(block_m) // row_mult) * row_mult)
    Bp = _round_up(B, block_m)
    nm = Bp // block_m

    # Pad activations only when geometry requires it.
    if Bp == B and Dp == D:
        x_p = x
    else:
        x_p = jnp.zeros((Bp, Dp), dtype=x.dtype).at[:B, :D].set(x)

    kernel = functools.partial(_classifier_kernel, d_true=int(D),
                               needs_mask=(Dp != D))

    # Grid order: weight resident (nc == 1) -> iterate batch tiles; otherwise
    # class-outer / batch-inner so each weight tile is DMA'd exactly once and
    # only the (small) x tiles re-stream.
    if nc == 1:
        grid = (nm, 1)
        x_map, p_map = (lambda i, j: (i, 0)), (lambda i, j: (0, 0))
        w_map, b_map = (lambda i, j: (0, j)), (lambda i, j: (0, j))
        o_map = lambda i, j: (i, j)
    else:
        grid = (nc, nm)
        x_map, p_map = (lambda j, i: (i, 0)), (lambda j, i: (0, 0))
        w_map, b_map = (lambda j, i: (0, j)), (lambda j, i: (0, j))
        o_map = lambda j, i: (i, j)

    vmem_limit = int(max(min(budget, 100 << 20), _need(block_m) + (4 << 20), 32 << 20))

    out_p = pl.pallas_call(
        kernel,
        out_shape=jax.ShapeDtypeStruct((Bp, Cp), x.dtype),
        grid_spec=pltpu.PrefetchScalarGridSpec(
            num_scalar_prefetch=0,
            grid=grid,
            in_specs=[
                pl.BlockSpec((block_m, Dp), x_map),       # x tile
                pl.BlockSpec((1, Dp), p_map),             # gamma
                pl.BlockSpec((1, Dp), p_map),             # beta
                pl.BlockSpec((Dp, block_c), w_map),       # weight tile
                pl.BlockSpec((1, block_c), b_map),        # bias tile
            ],
            out_specs=pl.BlockSpec((block_m, block_c), o_map),
        ),
        compiler_params=pltpu.CompilerParams(
            dimension_semantics=("parallel", "arbitrary"),
            vmem_limit_bytes=vmem_limit,
        ),
    )(x_p, params["gamma"], params["beta"], params["w"], params["bias"])

    if Bp == B and Cp == C:
        return out_p
    return out_p[:B, :C]


def _reference(x, gamma, beta, weight, bias):
    """Pure-JAX reference matching the PyTorch module (weight is (C, D))."""
    xf = x.astype(jnp.float32)
    mean = jnp.mean(xf, axis=-1, keepdims=True)
    var = jnp.mean((xf - mean) ** 2, axis=-1, keepdims=True)
    xn = (xf - mean) / jnp.sqrt(var + LN_EPS)
    xn = xn * gamma + beta
    return xn @ weight.T.astype(jnp.float32) + bias


if __name__ == "__main__":
    # Small shapes consistent with the module: batch=8, embed_dim=32, classes=16.
    B, D, C = 8, 32, 16
    key = jax.random.PRNGKey(0)
    kx, kw, kb = jax.random.split(key, 3)

    x = jax.random.normal(kx, (B, D), dtype=jnp.float32)
    # PyTorch layout: head.weight is (nb_classes, embed_dim).
    weight = (jax.random.uniform(kw, (C, D), dtype=jnp.float32) - 0.5) * (2.0 / jnp.sqrt(D))
    bias = (jax.random.uniform(kb, (C,), dtype=jnp.float32) - 0.5) * (2.0 / jnp.sqrt(D))
    gamma = jnp.ones((D,), dtype=jnp.float32)   # LayerNorm default init
    beta = jnp.zeros((D,), dtype=jnp.float32)

    params = prepare_classifier_params(gamma, beta, weight, bias)
    out = jax.block_until_ready(continual_classifier_forward(x, params))
    ref = _reference(x, gamma, beta, weight, bias)
    assert out.shape == (B, C)
    assert jnp.allclose(out, ref, atol=1e-4, rtol=1e-4), "mismatch (weight-resident path)"

    # Non-multiple batch exercises the row-padding path.
    B2 = 10
    x2 = jax.random.normal(jax.random.PRNGKey(1), (B2, D), dtype=jnp.float32)
    out2 = jax.block_until_ready(continual_classifier_forward(x2, params))
    ref2 = _reference(x2, gamma, beta, weight, bias)
    assert out2.shape == (B2, C)
    assert jnp.allclose(out2, ref2, atol=1e-4, rtol=1e-4), "mismatch (padded batch)"

    # Force the class-tiled (weight-doesn't-fit) path with a tiny sizing budget.
    C3 = 300
    w3 = (jax.random.uniform(jax.random.PRNGKey(2), (C3, D), dtype=jnp.float32) - 0.5) * 0.1
    b3 = (jax.random.uniform(jax.random.PRNGKey(3), (C3,), dtype=jnp.float32) - 0.5) * 0.1
    params3 = prepare_classifier_params(gamma, beta, w3, b3, vmem_budget=1 << 20)
    assert params3["cp"] // params3["block_c"] > 1      # really uses class tiling
    out3 = jax.block_until_ready(continual_classifier_forward(x, params3))
    ref3 = _reference(x, gamma, beta, w3, b3)
    assert out3.shape == (B, C3)
    assert jnp.allclose(out3, ref3, atol=1e-4, rtol=1e-4), "mismatch (class-tiled path)"

    print("KERNEL_OK")
</pallas_src>

<mosaic_0001>
module attributes {stable_mosaic.version = 11 : i64} {
  func.func @_classifier_kernel(%arg0: i32, %arg1: i32, %arg2: memref<8x128xf32, #tpu.memory_space<vmem>>, %arg3: memref<1x128xf32, #tpu.memory_space<vmem>>, %arg4: memref<1x128xf32, #tpu.memory_space<vmem>>, %arg5: memref<128x128xf32, #tpu.memory_space<vmem>>, %arg6: memref<1x128xf32, #tpu.memory_space<vmem>>, %arg7: memref<8x128xf32, #tpu.memory_space<vmem>>) attributes {dimension_semantics = [#tpu.dimension_semantics<parallel>, #tpu.dimension_semantics<arbitrary>], iteration_bounds = array<i64: 1, 1>, scalar_prefetch = 0 : i64, scratch_operands = 0 : i64, tpu.core_type = #tpu.core_type<tc>, window_params = [{transform_indices = @transform_0, window_bounds = array<i64: 8, 128>}, {pipeline_mode = #tpu.pipeline_mode<synchronous>, transform_indices = @transform_1, window_bounds = array<i64: 1, 128>}, {pipeline_mode = #tpu.pipeline_mode<synchronous>, transform_indices = @transform_2, window_bounds = array<i64: 1, 128>}, {transform_indices = @transform_3, window_bounds = array<i64: 128, 128>}, {transform_indices = @transform_4, window_bounds = array<i64: 1, 128>}, {transform_indices = @transform_5, window_bounds = array<i64: 8, 128>}]} {
    %c0 = arith.constant 0 : index
    %c0_0 = arith.constant 0 : index
    %0 = vector.load %arg2[%c0, %c0_0] : memref<8x128xf32, #tpu.memory_space<vmem>>, vector<8x128xf32>
    %cst = arith.constant dense<0.000000e+00> : vector<8xf32>
    %1 = vector.multi_reduction <add>, %0, %cst [1] : vector<8x128xf32> to vector<8xf32>
    %2 = vector.shape_cast %1 : vector<8xf32> to vector<8x1xf32>
    %cst_1 = arith.constant 3.125000e-02 : f32
    %3 = vector.broadcast %cst_1 : f32 to vector<8x1xf32>
    %4 = arith.mulf %2, %3 : vector<8x1xf32>
    %5 = vector.broadcast %4 : vector<8x1xf32> to vector<8x128xf32>
    %6 = arith.subf %0, %5 : vector<8x128xf32>
    %7 = tpu.iota {dimensions = array<i32: 1>} : vector<8x128xi32>
    %c32_i32 = arith.constant 32 : i32
    %8 = vector.broadcast %c32_i32 : i32 to vector<8x128xi32>
    %9 = arith.cmpi slt, %7, %8 : vector<8x128xi32>
    %cst_2 = arith.constant 0.000000e+00 : f32
    %10 = vector.broadcast %cst_2 : f32 to vector<8x128xf32>
    %11 = arith.select %9, %6, %10 : vector<8x128xi1>, vector<8x128xf32>
    %12 = arith.mulf %11, %11 : vector<8x128xf32>
    %cst_3 = arith.constant dense<0.000000e+00> : vector<8xf32>
    %13 = vector.multi_reduction <add>, %12, %cst_3 [1] : vector<8x128xf32> to vector<8xf32>
    %14 = vector.shape_cast %13 : vector<8xf32> to vector<8x1xf32>
    %cst_4 = arith.constant 3.125000e-02 : f32
    %15 = vector.broadcast %cst_4 : f32 to vector<8x1xf32>
    %16 = arith.mulf %14, %15 : vector<8x1xf32>
    %cst_5 = arith.constant 9.99999974E-6 : f32
    %17 = vector.broadcast %cst_5 : f32 to vector<8x1xf32>
    %18 = arith.addf %16, %17 : vector<8x1xf32>
    %19 = math.rsqrt %18 : vector<8x1xf32>
    %20 = vector.broadcast %19 : vector<8x1xf32> to vector<8x128xf32>
    %21 = arith.mulf %11, %20 : vector<8x128xf32>
    %c0_6 = arith.constant 0 : index
    %c0_7 = arith.constant 0 : index
    %22 = vector.load %arg3[%c0_6, %c0_7] : memref<1x128xf32, #tpu.memory_space<vmem>>, vector<1x128xf32>
    %23 = vector.broadcast %22 : vector<1x128xf32> to vector<8x128xf32>
    %24 = arith.mulf %21, %23 : vector<8x128xf32>
    %c0_8 = arith.constant 0 : index
    %c0_9 = arith.constant 0 : index
    %25 = vector.load %arg4[%c0_8, %c0_9] : memref<1x128xf32, #tpu.memory_space<vmem>>, vector<1x128xf32>
    %26 = vector.broadcast %25 : vector<1x128xf32> to vector<8x128xf32>
    %27 = arith.addf %24, %26 : vector<8x128xf32>
    %c0_10 = arith.constant 0 : index
    %c0_11 = arith.constant 0 : index
    %28 = vector.load %arg5[%c0_10, %c0_11] : memref<128x128xf32, #tpu.memory_space<vmem>>, vector<128x128xf32>
    %cst_12 = arith.constant dense<0.000000e+00> : vector<8x128xf32>
    %29 = tpu.matmul %27, %28, %cst_12 {dimension_numbers = #tpu.dot_dimension_numbers<[1], [0], [0], [1], [0, 0, 1, 1], [], []>} : vector<8x128xf32>, vector<128x128xf32>, vector<8x128xf32> -> vector<8x128xf32>
    %c0_13 = arith.constant 0 : index
    %c0_14 = arith.constant 0 : index
    %30 = vector.load %arg6[%c0_13, %c0_14] : memref<1x128xf32, #tpu.memory_space<vmem>>, vector<1x128xf32>
    %31 = vector.broadcast %30 : vector<1x128xf32> to vector<8x128xf32>
    %32 = arith.addf %29, %31 : vector<8x128xf32>
    %c0_15 = arith.constant 0 : index
    %c0_16 = arith.constant 0 : index
    %33 = vector.load %arg7[%c0_15, %c0_16] : memref<8x128xf32, #tpu.memory_space<vmem>>, vector<8x128xf32>
    tpu.vector_store %arg7[%c0_15, %c0_16], %32 {strides = array<i32>} : memref<8x128xf32, #tpu.memory_space<vmem>>, vector<8x128xf32>,
    return
  }
  func.func @transform_0(%arg0: i32, %arg1: i32) -> (i32, i32) {
    %c0_i32 = arith.constant 0 : i32
    %c0_i32_0 = arith.constant 0 : i32
    return %arg0, %c0_i32 : i32, i32
  }
  func.func @transform_1(%arg0: i32, %arg1: i32) -> (i32, i32) {
    %c0_i32 = arith.constant 0 : i32
    %c0_i32_0 = arith.constant 0 : i32
    %c0_i32_1 = arith.constant 0 : i32
    return %c0_i32, %c0_i32_0 : i32, i32
  }
  func.func @transform_2(%arg0: i32, %arg1: i32) -> (i32, i32) {
    %c0_i32 = arith.constant 0 : i32
    %c0_i32_0 = arith.constant 0 : i32
    %c0_i32_1 = arith.constant 0 : i32
    return %c0_i32, %c0_i32_0 : i32, i32
  }
  func.func @transform_3(%arg0: i32, %arg1: i32) -> (i32, i32) {
    %c0_i32 = arith.constant 0 : i32
    %c0_i32_0 = arith.constant 0 : i32
    return %c0_i32, %arg1 : i32, i32
  }
  func.func @transform_4(%arg0: i32, %arg1: i32) -> (i32, i32) {
    %c0_i32 = arith.constant 0 : i32
    %c0_i32_0 = arith.constant 0 : i32
    return %c0_i32, %arg1 : i32, i32
  }
  func.func @transform_5(%arg0: i32, %arg1: i32) -> (i32, i32) {
    %c0_i32 = arith.constant 0 : i32
    return %arg0, %arg1 : i32, i32
  }
}

</mosaic_0001>

<bundles_post_ra>
// kernel: tpu_custom_call.1
= control target key start
LH: loop header
LB: loop body
LE: loop exit
PB: predicated region body
PF: predicated region fallthrough
CT: control target
= control target key end

     0   :  { %10 = vsyncpa [#allocation3], 0  ;;  %s325_s0 = inlined_call_operand.hbm [shape: f32[8,128], index: 0, kind: input, shape index: {}]   ;;  %s326_s1 = inlined_call_operand.hbm [shape: f32[1,128], index: 1, kind: input, shape index: {}]   ;;  %s327_s2 = inlined_call_operand.vmem [shape: f32[1,128], index: 2, kind: input, shape index: {}]   ;;  %s328_s3 = inlined_call_operand.hbm [shape: f32[128,128], index: 3, kind: input, shape index: {}]   ;;  %s329_s4 = inlined_call_operand.vmem [shape: f32[1,128], index: 4, kind: input, shape index: {}]   ;;  %s330_s5 = inlined_call_operand.hbm [shape: f32[8,128], index: 5, kind: output, shape index: {}]  }
   0x1   :  { %11 = vsyncpa [#allocation6], 0  ;;  %s29_s20 = sshll.u32 %s326_s1, 4  ;;  %s30_s20 = int_to_ptr.hbm [resolvable:$true] %s29_s20 }
   0x2   :  { %12 = vsyncpa [#allocation4], 0  ;;  %s271_s21 = smov [#allocation5]   ;;  %s18_s25 = sshll.u32 %s325_s0, 4  ;;  %s19_s25 = int_to_ptr.hbm [resolvable:$true] %s18_s25 }
   0x3   :  { %s31_s22 = sshll.u32 %s271_s21, 4  ;;  %s272_s26 = smov [#allocation2]   ;;  %s32_s22 = int_to_ptr.vmem [resolvable:$true] %s31_s22 }
   0x4   :  { %34 = dma.hbm_to_vmem [thread:$0]  %s30_s20, 16, %s32_s22, [#allocation6]  }
   0x5   :  { %s20_s27 = sshll.u32 %s272_s26, 4  ;;  %s41_s30 = sshll.u32 %s328_s3, 4  ;;  %s21_s27 = int_to_ptr.vmem [resolvable:$true] %s20_s27  ;;  %s42_s30 = int_to_ptr.hbm [resolvable:$true] %s41_s30 }
   0x6   :  { %23 = dma.hbm_to_vmem [thread:$0]  %s19_s25, 128, %s21_s27, [#allocation3]  }
   0x7   :  { %s273_s1 = smov [#allocation7]   ;;  %s274_s7 = smov 128  }
   0x8   :  { %s43_s6 = sshll.u32 %s273_s1, 4  ;;  %s275_s8 = smov 8   ;;  %s44_s6 = int_to_ptr.vmem [resolvable:$true] %s43_s6 }
   0x9   :  { %49 = dma.hbm_to_vmem [thread:$0]  %s42_s30, 2048, %s44_s6, [#allocation6], %s274_s7, %s274_s7, %s275_s8  }
   0xa   :  { %265 = dma.done.wait [#allocation3], 128  }
   0xb   :  { %266 = vsyncadd [#allocation3], 4294967168 }
   0xc   :  { %267 = dma.done.wait [#allocation6], 2064  }
   0xd   :  { %268 = vsyncadd [#allocation6], 4294965232  ;;  %v64_v0 = vld [vmem:[#allocation2] sm:$0xff]  ;;  %v69_v3 = vlaneseq  ;;  %v112_v10 = vld [vmem:[#allocation7 + $0x68] sm:$0xff]  ;;  %s276_s11 = smov [#allocation8]   ;;  %s147_s15 = sshll.u32 %s330_s5, 4  ;;  %s148_s15 = int_to_ptr.hbm [resolvable:$true] %s147_s15 }
   0xe   :  { %65 = vadd.xlane.f32.xlu0 %v64_v0  ;;  %v114_v1 = vld [vmem:[#allocation7 + $0x78] sm:$0xff]  ;;  %v113_v2 = vld [vmem:[#allocation7 + $0x70] sm:$0xff]  ;;  %v111_v11 = vld [vmem:[#allocation7 + $0x60] sm:$0xff]  ;;  %s145_s12 = sshll.u32 %s276_s11, 4  ;;  %s146_s12 = int_to_ptr.vmem [resolvable:$true] %s145_s12 }
   0xf   :  { %119 = vmatpush.msra.mxu0 %v114_v1  ;;  %v70_v4 = vand.u32 127, %v69_v3  ;;  %v110_v12 = vld [vmem:[#allocation7 + $0x58] sm:$0xff]  ;;  %v109_v13 = vld [vmem:[#allocation7 + $0x50] sm:$0xff]  ;;  %v108_v14 = vld [vmem:[#allocation7 + $0x48] sm:$0xff] }
  0x10   :  { %v107_v15 = vld [vmem:[#allocation7 + $0x40] sm:$0xff]  ;;  %v106_v16 = vld [vmem:[#allocation7 + $0x38] sm:$0xff]  ;;  %v105_v17 = vld [vmem:[#allocation7 + $0x30] sm:$0xff] }
  0x11   :  { %120 = vmatpush.msra.mxu0 %v113_v2  ;;  %vm71_vm0 = vcmp.lt.s32.totalorder %v70_v4, 32  ;;  %v104_v18 = vld [vmem:[#allocation7 + $0x28] sm:$0xff]  ;;  %v103_v19 = vld [vmem:[#allocation7 + $0x20] sm:$0xff]  ;;  %v102_v20 = vld [vmem:[#allocation7 + $0x18] sm:$0xff] }
  0x12   :  { %v101_v21 = vld [vmem:[#allocation7 + $0x10] sm:$0xff]  ;;  %v100_v22 = vld [vmem:[#allocation7 + $0x8] sm:$0xff]  ;;  %v99_v23 = vld [vmem:[#allocation7] sm:$0xff] }
  0x13   :  { %121 = vmatpush.msra.mxu0 %v112_v10  ;;  %v164_v33 = vld [vmem:[#allocation5] ss:$0 sm:$0xff]  ;;  %v165_v36 = vld [vmem:[%s327_s2] ss:$0 sm:$0xff] }
  0x14   :  { %v166_v39 = vld [vmem:[%s329_s4] ss:$0 sm:$0xff] }
  0x15   :  { %122 = vmatpush.msra.mxu0 %v111_v11 }
  0x17   :  { %123 = vmatpush.msra.mxu0 %v110_v12 }
  0x19   :  { %124 = vmatpush.msra.mxu0 %v109_v13 }
  0x1b   :  { %125 = vmatpush.msra.mxu0 %v108_v14 }
  0x1d   :  { %126 = vmatpush.msra.mxu0 %v107_v15 }
  0x1f   :  { %127 = vmatpush.msra.mxu0 %v106_v16 }
  0x21   :  { %128 = vmatpush.msra.mxu0 %v105_v17 }
  0x23   :  { %129 = vmatpush.msra.mxu0 %v104_v18 }
  0x25   :  { %130 = vmatpush.msra.mxu0 %v103_v19 }
  0x27   :  { %131 = vmatpush.msra.mxu0 %v102_v20 }
  0x29   :  { %132 = vmatpush.msra.mxu0 %v101_v21 }
  0x2b   :  { %133 = vmatpush.msra.mxu0 %v100_v22 }
  0x2d   :  { %134 = vmatpush.msra.mxu0 %v99_v23 }
  0x81   :  { %v66_v5 = vpop.xlane.xlu0 %65 }
  0x82   :  { %v67_v6 = vmul.f32 0.03125, %v66_v5 }
  0x84   :  { %v68_v7 = vsub.f32 %v64_v0, %v67_v6 }
  0x86   :  { %v72_v8 = vsel %vm71_vm0, %v68_v7, 0.0 }
  0x87   :  { %v73_v9 = vmul.f32 %v72_v8, %v72_v8 }
  0x89   :  { %74 = vadd.xlane.f32.xlu0 %v73_v9 }
  0xfc   :  { %v75_v24 = vpop.xlane.xlu0 %74 }
  0xfd   :  { %v76_v25 = vmul.f32 0.03125, %v75_v24 }
  0xff   :  { %v77_v26 = vadd.f32 1e-05, %v76_v25 }
 0x101   :  { %167 = vrsqrt.f32 %v77_v26  ;;  %vm84_vm2 = vweird.f32 %v77_v26 }
 0x107   :  { %v168_v27 = vpop.eup %167 }
 0x108   :  { %v79_v28 = vmul.f32 %v168_v27, %v77_v26  ;;  %vm85_vm1 = vweird.f32 %v168_v27 }
 0x109   :  { %vm86_vm3 = vmor %vm84_vm2, %vm85_vm1 }
 0x10a   :  { %v80_v29 = vmul.f32 %v168_v27, %v79_v28 }
 0x10c   :  { %v81_v30 = vmul.f32 0.5, %v80_v29 }
 0x10e   :  { %v82_v31 = vsub.f32 1.5, %v81_v30 }
 0x110   :  { %v83_v32 = vmul.f32 %v168_v27, %v82_v31 }
 0x112   :  { %v87_v34 = vsel %vm86_vm3, %v168_v27, %v83_v32 }
 0x113   :  { %v88_v35 = vmul.f32 %v87_v34, %v72_v8 }
 0x115   :  { %v93_v37 = vmul.f32 %v164_v33, %v88_v35 }
 0x117   :  { %v98_v38 = vadd.f32 %v165_v36, %v93_v37 }
 0x119   :  { %135 = vmatmul.f32.vlgmr.msra.gmra.mxu0 %v98_v38 }
 0x196   :  { %v136_v40 = vpop.f32.mrf.mxu0 }
 0x197   :  { %v137_v41 = vadd.f32 %v166_v39, %v136_v40 }
 0x199   :  { %139 = vst [vmem:[#allocation8] sm:$0xff] %v137_v41 }
 0x19a   :  { %150 = dma.vmem_to_hbm [thread:$0]  %s146_s12, 128, %s148_s15, [#allocation4]  }
 0x19b   :  { %269 = dma.done.wait [#allocation4], 128  }
 0x19c   :  { %270 = vsyncadd [#allocation4], 4294967168 }
 0x19d   :  { %155 = vsyncpa [#allocation3], 1 }
 0x19e   :  { %156 = vsyncpa [#allocation6], 1 }
 0x19f   :  { %157 = vsyncpa [#allocation4], 1 }

</bundles_post_ra>
